<compile_context>
chip_gen: v6e
topology: v6e:2x2x1
jax: 0.10.0
libtpu: 0.0.40
codegen_flags: <defaults>
</compile_context>

<pallas_src>
import jax
import jax.numpy as jnp
from jax.experimental import pallas as pl
from jax.experimental.pallas import tpu as pltpu


def _cdiv(a: int, b: int) -> int:
    return -(-a // b)


def _round_up(n: int, m: int) -> int:
    return ((n + m - 1) // m) * m


def _choose_tb(B: int, F_full: int, tb_max: int) -> int:
    """Batch tile: large (amortize ~0.35us/grid-step overhead), VMEM-capped,
    >= 2 tiles for v7x megacore when possible, and never larger than the batch
    so only the LAST block is ragged."""
    if B <= 8:
        return B                                        # block == full batch dim
    # cap so the double-buffered f32 x tile stays ~<= 8 MiB (fits v7x's 64 MiB VMEM)
    cap = max(128, ((8 << 20) // (2 * F_full * 4)) // 128 * 128)
    tb = min(tb_max, cap, _round_up(_cdiv(B, 2), 128))  # keep >= 2 tiles for big B
    tb = max(tb, 128)
    tb = min(tb, (B // 8) * 8)                          # every block starts in-bounds
    return max(tb, 8)


def _expand_first_weight(w0, time_size: int, chan: int):
    """Absorb DropFirstValue into the first Linear: x is passed flattened WITH
    the time channel; rows of W that would multiply the t values are zero, so
    x_full @ W_full == x[..., 1:] @ W exactly (no wrapper slice/copy needed)."""
    out = w0.shape[1]
    data_size = chan - 1
    w3 = w0.reshape(time_size, data_size, out)
    w3 = jnp.pad(w3, ((0, 0), (1, 0), (0, 0)))          # zero row at the t slot
    return w3.reshape(time_size * chan, out)


def make_mlp_kernel(num_hidden: int):
    """Kernel refs: (x, W1, b1, ..., W_L, b_L, w_row, b_out, out).

    x is f32 (cast to bf16 in-kernel right before each dot), hidden weights and
    the final row-weight are bf16, biases f32, all matmuls accumulate in f32.
    Every op is row-independent, so ragged (garbage) batch rows stay isolated.
    """

    def kernel(*refs):
        x_ref = refs[0]
        o_ref = refs[-1]
        params = refs[1:-1]                              # 2 * num_hidden + 2 refs

        h = x_ref[...]                                   # (TB, F_full) f32
        for i in range(num_hidden):
            w = params[2 * i][...]                       # (in, U)  bf16
            b = params[2 * i + 1][...]                   # (1, U)   f32
            z = jnp.dot(h.astype(jnp.bfloat16), w,
                        preferred_element_type=jnp.float32) + b
            h = jnp.maximum(z, 0.0)                      # inter-layer math stays f32 (v5e VPU)

        # Final Linear(U, 1) on the MXU, emitted lane-dense: contract U with the
        # batch tile landing on the output lane axis -> (1, TB).  Avoids the
        # lane-sparse (TB, 1) epilogue (TB/8 masked vst.msk stores).
        w_row = params[-2][...]                          # (1, U_last) bf16
        b_out = params[-1][...]                          # (1, 1)      f32
        res = jax.lax.dot_general(
            w_row, h.astype(jnp.bfloat16),
            dimension_numbers=(((1,), (1,)), ((), ())),
            preferred_element_type=jnp.float32)          # (1, TB) f32
        o_ref[...] = (res + b_out).reshape(o_ref.shape)  # (1, 1, TB) block

    return kernel


def discriminator_simple(X, params, *, tile_b_max: int = 8192):
    """params: list of (W, b) with W stored (in, out); last pair maps to 1."""
    B, T, C = X.shape                                    # C = 1 + data_size
    F_full = T * C
    num_hidden = len(params) - 1

    # --- glue: free flatten view; DropFirstValue is absorbed into W1's zero rows
    x = X.reshape(B, F_full)

    w_first, b_first = params[0]
    prepared = [(_expand_first_weight(w_first, T, C), b_first)] + list(params[1:])

    TB = _choose_tb(B, F_full, tile_b_max)
    G = _cdiv(B, TB)

    # --- operands + specs: x streams (TB, F_full) f32 tiles, params stay resident
    kernel_args = [x]
    in_specs = [pl.BlockSpec((TB, F_full), lambda i: (i, 0))]

    param_entries = []
    resident_bytes = 0
    for li, (w, b) in enumerate(prepared):
        if li < num_hidden:
            w_k = w.astype(jnp.bfloat16)                 # (in, U)
            b_k = b.astype(jnp.float32).reshape(1, -1)   # (1, U)
        else:                                            # final layer -> row vector
            w_k = w.astype(jnp.bfloat16).reshape(1, -1)  # (1, U_last)
            b_k = b.astype(jnp.float32).reshape(1, 1)    # (1, 1)
        param_entries += [w_k, b_k]
        resident_bytes += int(w_k.size) * w_k.dtype.itemsize
        resident_bytes += int(b_k.size) * b_k.dtype.itemsize

    # Constant-index_map params: single-buffer them only when they are big enough
    # for the double-buffer to matter under v7x's 64 MiB VMEM.
    single_buf = resident_bytes > (8 << 20)

    def _const_spec(shape):
        if single_buf:
            return pl.BlockSpec(shape, lambda i: (0, 0), pipeline_mode=pl.Buffered(1))
        return pl.BlockSpec(shape, lambda i: (0, 0))

    for a in param_entries:
        kernel_args.append(a)
        in_specs.append(_const_spec(a.shape))

    # --- lane-dense output: one (1, 1, TB) row per grid tile, reshaped in wrapper
    out_shape = jax.ShapeDtypeStruct((G, 1, TB), jnp.float32)
    out_spec = pl.BlockSpec((1, 1, TB), lambda i: (i, 0, 0))

    # --- VMEM budget from the actual footprint (headroom for v7x's 64 MiB VMEM)
    est = (2 * TB * F_full * 4                      # x double-buffer (f32)
           + 2 * TB * 4                             # output double-buffer
           + (1 if single_buf else 2) * resident_bytes
           + (4 << 20))                             # slack
    vmem_limit = int(min(max(est, 32 << 20), 56 << 20))

    # --- advisory cost estimate
    dims = [F_full] + [w.shape[1] for (w, _) in prepared]
    flops = 2 * G * TB * sum(a * b for a, b in zip(dims[:-1], dims[1:]))
    bytes_accessed = int(x.size) * 4 + resident_bytes + G * TB * 4
    cost = pl.CostEstimate(flops=int(flops), transcendentals=0,
                           bytes_accessed=int(bytes_accessed))

    out = pl.pallas_call(
        make_mlp_kernel(num_hidden),
        out_shape=out_shape,
        grid=(G,),
        in_specs=in_specs,
        out_specs=out_spec,
        compiler_params=pltpu.CompilerParams(
            dimension_semantics=("parallel",),       # megacore shards the batch axis (v7x)
            vmem_limit_bytes=vmem_limit,
        ),
        cost_estimate=cost,
    )(*kernel_args)

    # Ragged tail rows (beyond B) hold garbage-row results: slice BEFORE any use.
    return out.reshape(G * TB)[:B].reshape(B, 1)


def init_params(key, data_size, time_size, num_layers, num_units):
    """Deterministic params; weights stored (in, out) so the kernel does x @ W + b."""
    params = []
    last = data_size * time_size
    for _ in range(num_layers):
        key, k1, k2 = jax.random.split(key, 3)
        bound = 1.0 / float(last) ** 0.5
        w = jax.random.uniform(k1, (last, num_units), jnp.float32, -bound, bound)
        b = jax.random.uniform(k2, (1, num_units), jnp.float32, -bound, bound)
        params.append((w, b))
        last = num_units
    key, k1, k2 = jax.random.split(key, 3)
    bound = 1.0 / float(last) ** 0.5
    w = jax.random.uniform(k1, (last, 1), jnp.float32, -bound, bound)
    b = jax.random.uniform(k2, (1, 1), jnp.float32, -bound, bound)
    params.append((w, b))
    return params


if __name__ == "__main__":
    data_size, time_size, num_layers, num_units = 4, 8, 2, 32
    batch = 2

    key = jax.random.PRNGKey(0)
    kx, kp = jax.random.split(key)
    X = jax.random.normal(kx, (batch, time_size, 1 + data_size), jnp.float32)
    params = init_params(kp, data_size, time_size, num_layers, num_units)

    out = discriminator_simple(X, params)
    out = jax.block_until_ready(out)
    assert out.shape == (batch, 1), out.shape

    # pure-JAX reference mimicking the kernel's bf16-matmul / f32-accumulate path
    xf = X[..., 1:].reshape(batch, -1)
    h = xf
    for w, b in params[:-1]:
        h = jnp.maximum(
            jnp.dot(h.astype(jnp.bfloat16), w.astype(jnp.bfloat16),
                    preferred_element_type=jnp.float32) + b.reshape(1, -1), 0.0)
    ref = jnp.dot(h.astype(jnp.bfloat16), params[-1][0].astype(jnp.bfloat16),
                  preferred_element_type=jnp.float32) + params[-1][1].reshape(1, -1)
    assert jnp.allclose(out, ref, atol=1e-3, rtol=1e-3), (out, ref)

    # sanity vs full-f32 math (loose: bf16 streaming precision)
    h32 = xf
    for w, b in params[:-1]:
        h32 = jnp.maximum(h32 @ w + b.reshape(1, -1), 0.0)
    ref32 = h32 @ params[-1][0] + params[-1][1].reshape(1, -1)
    assert jnp.allclose(out, ref32, atol=5e-2, rtol=5e-2), (out, ref32)

    print("KERNEL_OK")
</pallas_src>

<mosaic_0001>
module attributes {stable_mosaic.version = 11 : i64} {
  func.func @kernel(%arg0: i32, %arg1: memref<2x40xf32, #tpu.memory_space<vmem>>, %arg2: memref<40x32xbf16, #tpu.memory_space<vmem>>, %arg3: memref<1x32xf32, #tpu.memory_space<vmem>>, %arg4: memref<32x32xbf16, #tpu.memory_space<vmem>>, %arg5: memref<1x32xf32, #tpu.memory_space<vmem>>, %arg6: memref<1x32xbf16, #tpu.memory_space<vmem>>, %arg7: memref<1x1xf32, #tpu.memory_space<vmem>>, %arg8: memref<1x1x2xf32, #tpu.memory_space<vmem>>) attributes {dimension_semantics = [#tpu.dimension_semantics<parallel>], iteration_bounds = array<i64: 1>, scalar_prefetch = 0 : i64, scratch_operands = 0 : i64, tpu.core_type = #tpu.core_type<tc>, window_params = [{transform_indices = @transform_0, window_bounds = array<i64: 2, 40>}, {pipeline_mode = #tpu.pipeline_mode<synchronous>, transform_indices = @transform_1, window_bounds = array<i64: 40, 32>}, {pipeline_mode = #tpu.pipeline_mode<synchronous>, transform_indices = @transform_2, window_bounds = array<i64: 1, 32>}, {pipeline_mode = #tpu.pipeline_mode<synchronous>, transform_indices = @transform_3, window_bounds = array<i64: 32, 32>}, {pipeline_mode = #tpu.pipeline_mode<synchronous>, transform_indices = @transform_4, window_bounds = array<i64: 1, 32>}, {pipeline_mode = #tpu.pipeline_mode<synchronous>, transform_indices = @transform_5, window_bounds = array<i64: 1, 32>}, {pipeline_mode = #tpu.pipeline_mode<synchronous>, transform_indices = @transform_6, window_bounds = array<i64: 1, 1>}, {transform_indices = @transform_7, window_bounds = array<i64: 1, 1, 2>}]} {
    %c0 = arith.constant 0 : index
    %c0_0 = arith.constant 0 : index
    %0 = vector.load %arg1[%c0, %c0_0] : memref<2x40xf32, #tpu.memory_space<vmem>>, vector<2x40xf32>
    %c0_1 = arith.constant 0 : index
    %c0_2 = arith.constant 0 : index
    %1 = vector.load %arg2[%c0_1, %c0_2] : memref<40x32xbf16, #tpu.memory_space<vmem>>, vector<40x32xbf16>
    %c0_3 = arith.constant 0 : index
    %c0_4 = arith.constant 0 : index
    %2 = vector.load %arg3[%c0_3, %c0_4] : memref<1x32xf32, #tpu.memory_space<vmem>>, vector<1x32xf32>
    %3 = arith.truncf %0 : vector<2x40xf32> to vector<2x40xbf16>
    %cst = arith.constant dense<0.000000e+00> : vector<2x32xf32>
    %4 = tpu.matmul %3, %1, %cst {dimension_numbers = #tpu.dot_dimension_numbers<[1], [0], [0], [1], [0, 0, 1, 1], [], []>} : vector<2x40xbf16>, vector<40x32xbf16>, vector<2x32xf32> -> vector<2x32xf32>
    %5 = vector.broadcast %2 : vector<1x32xf32> to vector<2x32xf32>
    %6 = arith.addf %4, %5 : vector<2x32xf32>
    %cst_5 = arith.constant 0.000000e+00 : f32
    %7 = vector.broadcast %cst_5 : f32 to vector<2x32xf32>
    %8 = arith.maximumf %6, %7 : vector<2x32xf32>
    %c0_6 = arith.constant 0 : index
    %c0_7 = arith.constant 0 : index
    %9 = vector.load %arg4[%c0_6, %c0_7] : memref<32x32xbf16, #tpu.memory_space<vmem>>, vector<32x32xbf16>
    %c0_8 = arith.constant 0 : index
    %c0_9 = arith.constant 0 : index
    %10 = vector.load %arg5[%c0_8, %c0_9] : memref<1x32xf32, #tpu.memory_space<vmem>>, vector<1x32xf32>
    %11 = arith.truncf %8 : vector<2x32xf32> to vector<2x32xbf16>
    %cst_10 = arith.constant dense<0.000000e+00> : vector<2x32xf32>
    %12 = tpu.matmul %11, %9, %cst_10 {dimension_numbers = #tpu.dot_dimension_numbers<[1], [0], [0], [1], [0, 0, 1, 1], [], []>} : vector<2x32xbf16>, vector<32x32xbf16>, vector<2x32xf32> -> vector<2x32xf32>
    %13 = vector.broadcast %10 : vector<1x32xf32> to vector<2x32xf32>
    %14 = arith.addf %12, %13 : vector<2x32xf32>
    %cst_11 = arith.constant 0.000000e+00 : f32
    %15 = vector.broadcast %cst_11 : f32 to vector<2x32xf32>
    %16 = arith.maximumf %14, %15 : vector<2x32xf32>
    %c0_12 = arith.constant 0 : index
    %c0_13 = arith.constant 0 : index
    %17 = vector.load %arg6[%c0_12, %c0_13] : memref<1x32xbf16, #tpu.memory_space<vmem>>, vector<1x32xbf16>
    %c0_14 = arith.constant 0 : index
    %c0_15 = arith.constant 0 : index
    %18 = vector.load %arg7[%c0_14, %c0_15] : memref<1x1xf32, #tpu.memory_space<vmem>>, vector<1x1xf32>
    %19 = arith.truncf %16 : vector<2x32xf32> to vector<2x32xbf16>
    %cst_16 = arith.constant dense<0.000000e+00> : vector<1x2xf32>
    %20 = tpu.matmul %17, %19, %cst_16 {dimension_numbers = #tpu.dot_dimension_numbers<[1], [1], [0], [0], [0, 0, 1, 0], [], []>} : vector<1x32xbf16>, vector<2x32xbf16>, vector<1x2xf32> -> vector<1x2xf32>
    %21 = vector.broadcast %18 : vector<1x1xf32> to vector<1x2xf32>
    %22 = arith.addf %20, %21 : vector<1x2xf32>
    %23 = vector.shape_cast %22 : vector<1x2xf32> to vector<1x1x2xf32>
    %c0_17 = arith.constant 0 : index
    %c0_18 = arith.constant 0 : index
    %c0_19 = arith.constant 0 : index
    %24 = vector.load %arg8[%c0_17, %c0_18, %c0_19] : memref<1x1x2xf32, #tpu.memory_space<vmem>>, vector<1x1x2xf32>
    tpu.vector_store %arg8[%c0_17, %c0_18, %c0_19], %23 {strides = array<i32>} : memref<1x1x2xf32, #tpu.memory_space<vmem>>, vector<1x1x2xf32>,
    return
  }
  func.func @transform_0(%arg0: i32) -> (i32, i32) {
    %c0_i32 = arith.constant 0 : i32
    %c0_i32_0 = arith.constant 0 : i32
    return %arg0, %c0_i32 : i32, i32
  }
  func.func @transform_1(%arg0: i32) -> (i32, i32) {
    %c0_i32 = arith.constant 0 : i32
    %c0_i32_0 = arith.constant 0 : i32
    %c0_i32_1 = arith.constant 0 : i32
    return %c0_i32, %c0_i32_0 : i32, i32
  }
  func.func @transform_2(%arg0: i32) -> (i32, i32) {
    %c0_i32 = arith.constant 0 : i32
    %c0_i32_0 = arith.constant 0 : i32
    %c0_i32_1 = arith.constant 0 : i32
    return %c0_i32, %c0_i32_0 : i32, i32
  }
  func.func @transform_3(%arg0: i32) -> (i32, i32) {
    %c0_i32 = arith.constant 0 : i32
    %c0_i32_0 = arith.constant 0 : i32
    %c0_i32_1 = arith.constant 0 : i32
    return %c0_i32, %c0_i32_0 : i32, i32
  }
  func.func @transform_4(%arg0: i32) -> (i32, i32) {
    %c0_i32 = arith.constant 0 : i32
    %c0_i32_0 = arith.constant 0 : i32
    %c0_i32_1 = arith.constant 0 : i32
    return %c0_i32, %c0_i32_0 : i32, i32
  }
  func.func @transform_5(%arg0: i32) -> (i32, i32) {
    %c0_i32 = arith.constant 0 : i32
    %c0_i32_0 = arith.constant 0 : i32
    %c0_i32_1 = arith.constant 0 : i32
    return %c0_i32, %c0_i32_0 : i32, i32
  }
  func.func @transform_6(%arg0: i32) -> (i32, i32) {
    %c0_i32 = arith.constant 0 : i32
    %c0_i32_0 = arith.constant 0 : i32
    %c0_i32_1 = arith.constant 0 : i32
    return %c0_i32, %c0_i32_0 : i32, i32
  }
  func.func @transform_7(%arg0: i32) -> (i32, i32, i32) {
    %c0_i32 = arith.constant 0 : i32
    %c0_i32_0 = arith.constant 0 : i32
    %c0_i32_1 = arith.constant 0 : i32
    return %arg0, %c0_i32, %c0_i32_0 : i32, i32, i32
  }
}

</mosaic_0001>

<bundles_post_ra>
// kernel: tpu_custom_call.1
= control target key start
LH: loop header
LB: loop body
LE: loop exit
PB: predicated region body
PF: predicated region fallthrough
CT: control target
= control target key end

     0   :  { %s409_s0 = inlined_call_operand.vmem [shape: f32[2,40], index: 0, kind: input, shape index: {}]   ;;  %s410_s1 = inlined_call_operand.vmem [shape: bf16[40,32], index: 1, kind: input, shape index: {}]   ;;  %s411_s2 = inlined_call_operand.vmem [shape: f32[1,32], index: 2, kind: input, shape index: {}]   ;;  %s412_s3 = inlined_call_operand.vmem [shape: bf16[32,32], index: 3, kind: input, shape index: {}]   ;;  %s413_s4 = inlined_call_operand.vmem [shape: f32[1,32], index: 4, kind: input, shape index: {}]   ;;  %s414_s5 = inlined_call_operand.vmem [shape: bf16[1,32], index: 5, kind: input, shape index: {}]   ;;  %s415_s6 = inlined_call_operand.<no memory space> [shape: f32[1,1], index: 6, kind: input, shape index: {}]   ;;  %s416_s7 = inlined_call_operand.hbm [shape: f32[1,1,2], index: 7, kind: output, shape index: {}]  }
   0x1   :  { %v12_v0 = vstv %s415_s6 }
   0x2   :  { %13 = vst [vmem:[#allocation2] sm:$0x1] %v12_v0 }
   0x3   :  { %v299_v1 = vld [vmem:[%s410_s1 + $0x10] ss:$0 sps:$4 sm:$0xff]   ;;  %vm63_vm0 = vcmask 1043456   ;;  %v326_v2 = vmov 0.0   ;;  %vm327_vm1 = vmmov 0   ;;  %v300_v4 = vld [vmem:[%s410_s1 + $0x8] sm:$0xff]  }
   0x4   :  { %270 = vmatprep.subr.bf16.mxu0 %v326_v2  ;;  %280 = vmatprep.subr.bf16.mxu1 %v326_v2  ;;  %v65_v3 = vsel %vm63_vm0, %v299_v1, 0 }
   0x5   :  { %276 = vmatprep.mubr.msk.bf16.mxu0 %vm327_vm1, %v326_v2  ;;  %284 = vmatprep.mubr.msk.bf16.mxu1 %vm327_vm1, %v326_v2 }
   0x6   :  { %271 = vmatpush3.bf16.msra.mxu0 %v65_v3 }
   0x7   :  { %272 = vmatprep.subr.bf16.mxu0 %v326_v2 }
   0x8   :  { %14 = vsyncpa [#allocation4], 0  ;;  %v301_v5 = vld [vmem:[%s410_s1] sm:$0xff]   ;;  %vm59_vm2 = vcmask 326656   ;;  %v302_v8 = vld [vmem:[%s412_s3 + $0x8] sm:$0xff]   ;;  %vm132_vm3 = vcmask 261120   ;;  %v185_v30 = vlaneseq }
   0x9   :  { %v30_v6 = vld [vmem:[%s409_s0] sm:$0x3]  ;;  %281 = vmatpush3.bf16.msra.mxu1 %v302_v8  ;;  %v328_v19 = vmov 0   ;;  %vm235_vm4 = vcmask 8192  }
   0xa   :  { %273 = vmatpush3.bf16.msra.mxu0 %v300_v4  ;;  %v37_v7 = vpack.c.bf16 %v30_v6, %v30_v6  ;;  %282 = vmatprep.subr.bf16.mxu1 %v326_v2  ;;  %v303_v9 = vld [vmem:[%s412_s3] sm:$0xff]   ;;  %v186_v31 = vshrl.u32 %v185_v30, 7 }
   0xb   :  { %274 = vmatprep.subr.bf16.mxu0 %v326_v2  ;;  %v251_v10 = vld [vmem:[%s411_s2] ss:$0 sm:$0xff]  ;;  %298 = vset.pattern.permute.xlu0 %v328_v19 }
   0xc   :  { %v178_v18 = vld [vmem:[#allocation2] sm:$0x1]  ;;  %v187_v32 = vsub.s32 0, %v186_v31 }
   0xd   :  { %283 = vmatpush3.bf16.msra.mxu1 %v303_v9  ;;  %182 = vperm.xlu0 %298, %v178_v18   ;;  %v256_v20 = vld [vmem:[%s413_s4] ss:$0 sm:$0xff]  ;;  %s329_s4 = smov [#allocation3]  }
   0xe   :  { %275 = vmatpush3.bf16.msra.mxu0 %v301_v5  ;;  %288 = vmatprep.subr.bf16.mxu1 %v326_v2  ;;  %v177_v29 = vld [vmem:[%s414_s5] sm:$0x1]  ;;  %s243_s16 = sshll.u32 %s329_s4, 4  ;;  %s244_s16 = int_to_ptr.vmem [resolvable:$true] %s243_s16 }
   0xf   :  { %s304_s17 = scalar_lea.vmem %s244_s16, 16  ;;  %s308_s18 = scalar_lea.vmem %s244_s16, 32 }
  0x10   :  { %p305_p0 = scmp.ne.s32.totalorder %s244_s16, %s304_s17  ;;  %p309_p1 = scmp.lt.s32.totalorder %s244_s16, %s244_s16 }
  0x11   :  { %277 = vmatmul.mubr.msk.bf16.vlgmr.msra.gmra.mxu0 %vm59_vm2, %v37_v7  ;;  %p310_p2 = scmp.lt.s32.totalorder %s308_s18, %s304_s17 }
  0x13   :  { %p311_p3 = por %p310_p2, %p309_p1 }
  0x15   :  { %p312_p4 = pnand %p311_p3, %p305_p0 }
  0x88   :  { %v183_v33 = vpop.permute.xlu0 %182 }
  0x89   :  { %v188_v34 = vrot.slane %v183_v33, %v187_v32 }
  0xd1   :  { %v101_v11 = vpop.f32.mrf.mxu0 }
  0xd2   :  { %v102_v12 = vadd.f32 %v251_v10, %v101_v11 }
  0xd3   :  { %v278_v13 = vpop.f32.mrf.mxu0 }
  0xd4   :  { %v107_v14 = vmax.f32 %v102_v12, 0.0 }
  0xd5   :  { %v104_v15 = vpop.f32.mrf.mxu0 }
  0xd6   :  { %v113_v16 = vpack.c.bf16 %v107_v14, %v107_v14 }
  0xd7   :  { %v279_v17 = vpop.f32.mrf.mxu0 }
  0xd8   :  { %285 = vmatmul.mubr.msk.bf16.vlgmr.msra.gmra.mxu1 %vm132_vm3, %v113_v16 }
  0xd9   :  { %290 = vmatprep.mubr.msk.bf16.mxu1 %vm327_vm1, %v326_v2 }
 0x198   :  { %v170_v21 = vpop.f32.mrf.mxu1 }
 0x199   :  { %v171_v22 = vadd.f32 %v256_v20, %v170_v21 }
 0x19a   :  { %v286_v23 = vpop.f32.mrf.mxu1 }
 0x19b   :  { %v176_v24 = vmax.f32 %v171_v22, 0.0 }
 0x19c   :  { %v173_v25 = vpop.f32.mrf.mxu1 }
 0x19d   :  { %v179_v26 = vpack.c.bf16 %v176_v24, %v176_v24 }
 0x19e   :  { %v287_v27 = vpop.f32.mrf.mxu1 }
 0x19f   :  { %v193_v28 = vsel %vm132_vm3, %v179_v26, 0 }
 0x1a0   :  { %289 = vmatpush3.bf16.xpose.msra.mxu1 %v193_v28 }
 0x1a7   :  { %291 = vmatmul.mubr.msk.bf16.vlgmr.msra.gmra.mxu1 %vm132_vm3, %v177_v29 }
 0x267   :  { %v229_v35 = vpop.f32.mrf.mxu1 }
 0x268   :  { %v230_v36 = vadd.f32 %v229_v35, %v188_v34 }
 0x269   :  { %v292_v37 = vpop.f32.mrf.mxu1 }
 0x26a   :  { %236 = vst.msk [vmem:[#allocation3] sm:$0x1] %vm235_vm4, %v230_v36 }
 0x26b   :  { %v232_v38 = vpop.f32.mrf.mxu1 }
 0x26c   :  { %315 = shalt.err (!%p312_p4)
}
 0x26d   :  { %246 = dma.vmem_to_hbm [thread:$0]  %s244_s16, 16, %s416_s7, [#allocation4]   ;;  %v293_v39 = vpop.f32.mrf.mxu1 }
 0x26e   :  { %324 = dma.done.wait [#allocation4], 16  }
 0x26f   :  { %325 = vsyncadd [#allocation4], 4294967280 }
 0x270   :  { %250 = vsyncpa [#allocation4], 1 }

</bundles_post_ra>
